<compile_context>
chip_gen: v7x
topology: tpu7x:2x2x1
jax: 0.10.0
libtpu: 0.0.40
codegen_flags: <defaults>
</compile_context>

<pallas_src>
import math
import functools

import jax
import jax.numpy as jnp
from jax.experimental import pallas as pl
from jax.experimental.pallas import tpu as pltpu


_LANE = 128
_VMEM_LIMIT = 48 * 1024 * 1024          # fits v7x (64 MiB/TC) and v5e/v6e
_RESIDENT_Y_BYTES = 24 * 1024 * 1024    # budget for resident bf16 Y (x2 bufs)


def _round_up(v, m):
    return ((v + m - 1) // m) * m


def _pick_tile(total, prefer, min_tiles=1):
    """Largest multiple-of-128 tile <= `prefer` that divides `total`,
    preferring at least `min_tiles` tiles along the axis (keeps >= 2 row
    tiles so the 'parallel' axis shards across v7x's two TensorCores)."""
    t = (min(prefer, total) // _LANE) * _LANE
    while t >= _LANE:
        if total % t == 0 and total // t >= min_tiles:
            return t
        t -= _LANE
    return _LANE


# ---------------------------------------------------------------------------
# Pass 1: Y = x @ W + bias   (row tiles x contraction tiles, f32 accumulator,
#                             bf16 output)
# ---------------------------------------------------------------------------
def _xw_bias_kernel(x_ref, w_ref, b_ref, y_ref, acc_ref):
    k = pl.program_id(1)

    @pl.when(k == 0)
    def _():
        acc_ref[...] = jnp.zeros_like(acc_ref)

    acc_ref[...] += jnp.dot(
        x_ref[...], w_ref[...], preferred_element_type=jnp.float32
    )

    @pl.when(k == pl.num_programs(1) - 1)
    def _():
        y_ref[...] = (acc_ref[...] + b_ref[...]).astype(y_ref.dtype)


# ---------------------------------------------------------------------------
# Pass 2: out = A @ Y   (bf16 inputs, f32 accumulation directly in o_ref)
# ---------------------------------------------------------------------------
def _ay_resident_kernel(a_ref, y_ref, o_ref, *, tk):
    # Y is a grid-invariant VMEM-resident block; slice the reduction chunk.
    k = pl.program_id(1)

    @pl.when(k == 0)
    def _():
        o_ref[...] = jnp.zeros_like(o_ref)

    start = pl.multiple_of(k * tk, tk)
    y_blk = y_ref[pl.ds(start, tk), :]
    o_ref[...] += jnp.dot(a_ref[...], y_blk, preferred_element_type=jnp.float32)


def _ay_streamed_kernel(a_ref, y_ref, o_ref):
    k = pl.program_id(1)

    @pl.when(k == 0)
    def _():
        o_ref[...] = jnp.zeros_like(o_ref)

    o_ref[...] += jnp.dot(
        a_ref[...], y_ref[...], preferred_element_type=jnp.float32
    )


@jax.jit
def hgnn_conv(x, A, weight, bias):
    """Pallas HGNNConv forward.

    x      : (N, in_ft)      float32
    A      : (N, N)          float32
    weight : (in_ft, out_ft) float32
    bias   : (out_ft,)       float32 (or None)
    returns (N, out_ft)      float32
    """
    N, in_ft = x.shape
    out_ft = weight.shape[1]

    x = x.astype(jnp.float32)
    weight = weight.astype(jnp.float32)
    if bias is None:
        bias2d = jnp.zeros((1, out_ft), jnp.float32)
    else:
        bias2d = bias.reshape(1, out_ft).astype(jnp.float32)

    # Pad only to the 128-lane layout minimum, and only when needed.
    Np = _round_up(N, _LANE)
    INp = _round_up(in_ft, _LANE)
    OUTp = _round_up(out_ft, _LANE)

    x_p = x if (Np == N and INp == in_ft) else jnp.pad(
        x, ((0, Np - N), (0, INp - in_ft)))
    w_p = weight if (INp == in_ft and OUTp == out_ft) else jnp.pad(
        weight, ((0, INp - in_ft), (0, OUTp - out_ft)))
    b_p = bias2d if OUTp == out_ft else jnp.pad(
        bias2d, ((0, 0), (0, OUTp - out_ft)))
    a_src = A if Np == N else jnp.pad(A, ((0, Np - N), (0, Np - N)))
    # bf16 A at the kernel boundary (fuses with the pad when a pad is needed);
    # accumulation stays float32 inside the kernel.
    a_p = a_src.astype(jnp.bfloat16)

    cparams = pltpu.CompilerParams(
        dimension_semantics=("parallel", "arbitrary"),
        vmem_limit_bytes=_VMEM_LIMIT,
    )

    # ---- Pass 1: Y = x @ W + bias  (bf16 Y) --------------------------------
    tm1 = _pick_tile(Np, 512, min_tiles=2)
    tk1 = _pick_tile(INp, 1024)

    y_p = pl.pallas_call(
        _xw_bias_kernel,
        out_shape=jax.ShapeDtypeStruct((Np, OUTp), jnp.bfloat16),
        grid=(Np // tm1, INp // tk1),                 # reduction axis last
        in_specs=[
            pl.BlockSpec((tm1, tk1), lambda i, k: (i, k)),
            pl.BlockSpec((tk1, OUTp), lambda i, k: (k, 0)),
            pl.BlockSpec((1, OUTp), lambda i, k: (0, 0)),   # grid-invariant
        ],
        out_specs=pl.BlockSpec((tm1, OUTp), lambda i, k: (i, 0)),
        scratch_shapes=[pltpu.VMEM((tm1, OUTp), jnp.float32)],
        compiler_params=cparams,
        cost_estimate=pl.CostEstimate(
            flops=2 * Np * INp * OUTp,
            transcendentals=0,
            bytes_accessed=4 * (Np * INp + INp * OUTp + OUTp) + 2 * Np * OUTp,
        ),
    )(x_p, w_p, b_p)

    # ---- Pass 2: out = A @ Y  (bf16 streams, f32 accumulate in o_ref) ------
    tm2 = _pick_tile(Np, 512, min_tiles=2)
    tk2 = _pick_tile(Np, 512)

    resident_y = (Np * OUTp * 2) * 2 <= _RESIDENT_Y_BYTES   # bf16, x2 buffers
    if resident_y:
        kernel2 = functools.partial(_ay_resident_kernel, tk=tk2)
        y_spec = pl.BlockSpec((Np, OUTp), lambda i, k: (0, 0))  # resident
        y_bytes = 2 * Np * OUTp
    else:
        kernel2 = _ay_streamed_kernel
        y_spec = pl.BlockSpec((tk2, OUTp), lambda i, k: (k, 0))
        y_bytes = 2 * Np * OUTp * (Np // tm2)

    out_p = pl.pallas_call(
        kernel2,
        out_shape=jax.ShapeDtypeStruct((Np, OUTp), jnp.float32),
        grid=(Np // tm2, Np // tk2),                  # reduction axis last
        in_specs=[
            pl.BlockSpec((tm2, tk2), lambda i, k: (i, k)),
            y_spec,
        ],
        out_specs=pl.BlockSpec((tm2, OUTp), lambda i, k: (i, 0)),
        compiler_params=cparams,
        cost_estimate=pl.CostEstimate(
            flops=2 * Np * Np * OUTp,
            transcendentals=0,
            bytes_accessed=2 * Np * Np + y_bytes + 4 * Np * OUTp,
        ),
    )(a_p, y_p)

    return out_p[:N, :out_ft]


if __name__ == "__main__":
    # Small multi-tile shapes: N=512 exercises the (2, 1) pass-2 grid, the
    # resident-Y path, and feature padding (96 -> 128, 64 -> 128).
    N, in_ft, out_ft = 512, 96, 64

    key = jax.random.PRNGKey(0)
    k_x, k_a, k_w, k_b = jax.random.split(key, 4)

    # Deterministic parameter init matching reset_parameters():
    # uniform(-stdv, stdv), stdv = 1/sqrt(out_ft)
    stdv = 1.0 / math.sqrt(out_ft)
    weight = jax.random.uniform(k_w, (in_ft, out_ft), jnp.float32, -stdv, stdv)
    bias = jax.random.uniform(k_b, (out_ft,), jnp.float32, -stdv, stdv)

    x = jax.random.normal(k_x, (N, in_ft), jnp.float32)
    A = jax.random.normal(k_a, (N, N), jnp.float32)

    out = jax.block_until_ready(hgnn_conv(x, A, weight, bias))
    assert out.shape == (N, out_ft)

    # Reference matching the kernel's bf16-A / bf16-Y (f32 accumulate) path.
    hi = jax.lax.Precision.HIGHEST
    y_f32 = jnp.dot(x, weight, precision=hi) + bias
    ref_bf16 = jnp.dot(
        A.astype(jnp.bfloat16).astype(jnp.float32),
        y_f32.astype(jnp.bfloat16).astype(jnp.float32),
        precision=hi,
    )
    assert jnp.allclose(out, ref_bf16, atol=5e-2, rtol=2e-3), \
        "mismatch vs bf16-matched reference"

    # Loose sanity check against the pure-f32 reference (bf16 stream tradeoff).
    ref_f32 = jnp.dot(A, y_f32, precision=hi)
    rel = jnp.max(jnp.abs(out - ref_f32)) / (jnp.max(jnp.abs(ref_f32)) + 1e-6)
    assert rel < 3e-2, f"relative error vs f32 reference too large: {rel}"

    print("KERNEL_OK")
</pallas_src>

<mosaic_0001>
module attributes {stable_mosaic.version = 11 : i64} {
  func.func @_ay_resident_kernel(%arg0: i32, %arg1: i32, %arg2: memref<256x512xbf16, #tpu.memory_space<vmem>>, %arg3: memref<512x128xbf16, #tpu.memory_space<vmem>>, %arg4: memref<256x128xf32, #tpu.memory_space<vmem>>) attributes {dimension_semantics = [#tpu.dimension_semantics<parallel>, #tpu.dimension_semantics<arbitrary>], iteration_bounds = array<i64: 2, 1>, scalar_prefetch = 0 : i64, scratch_operands = 0 : i64, tpu.core_type = #tpu.core_type<tc>, window_params = [{transform_indices = @transform_0, window_bounds = array<i64: 256, 512>}, {pipeline_mode = #tpu.pipeline_mode<synchronous>, transform_indices = @transform_1, window_bounds = array<i64: 512, 128>}, {transform_indices = @transform_2, window_bounds = array<i64: 256, 128>}]} {
    %c0_i32 = arith.constant 0 : i32
    %0 = arith.cmpi eq, %arg1, %c0_i32 : i32
    %1 = arith.extui %0 : i1 to i32
    %c0_i32_0 = arith.constant 0 : i32
    %2 = arith.cmpi ne, %1, %c0_i32_0 : i32
    scf.if %2 {
      %cst_7 = arith.constant 0.000000e+00 : f32
      %12 = vector.broadcast %cst_7 : f32 to vector<256x128xf32>
      %c0_8 = arith.constant 0 : index
      %c0_9 = arith.constant 0 : index
      %13 = vector.load %arg4[%c0_8, %c0_9] : memref<256x128xf32, #tpu.memory_space<vmem>>, vector<256x128xf32>
      tpu.vector_store %arg4[%c0_8, %c0_9], %12 {strides = array<i32>} : memref<256x128xf32, #tpu.memory_space<vmem>>, vector<256x128xf32>,
    } else {
    }
    %c512_i32 = arith.constant 512 : i32
    %3 = arith.muli %arg1, %c512_i32 : i32
    %4 = tpu.assume_multiple %3, 512 : i32
    %5 = arith.index_cast %4 : i32 to index
    %c0 = arith.constant 0 : index
    %6 = vector.load %arg3[%5, %c0] : memref<512x128xbf16, #tpu.memory_space<vmem>>, vector<512x128xbf16>
    %c0_1 = arith.constant 0 : index
    %c0_2 = arith.constant 0 : index
    %7 = vector.load %arg4[%c0_1, %c0_2] : memref<256x128xf32, #tpu.memory_space<vmem>>, vector<256x128xf32>
    %c0_3 = arith.constant 0 : index
    %c0_4 = arith.constant 0 : index
    %8 = vector.load %arg2[%c0_3, %c0_4] : memref<256x512xbf16, #tpu.memory_space<vmem>>, vector<256x512xbf16>
    %cst = arith.constant dense<0.000000e+00> : vector<256x128xf32>
    %9 = tpu.matmul %8, %6, %cst {dimension_numbers = #tpu.dot_dimension_numbers<[1], [0], [0], [1], [0, 0, 1, 1], [], []>} : vector<256x512xbf16>, vector<512x128xbf16>, vector<256x128xf32> -> vector<256x128xf32>
    %10 = arith.addf %7, %9 : vector<256x128xf32>
    %c0_5 = arith.constant 0 : index
    %c0_6 = arith.constant 0 : index
    %11 = vector.load %arg4[%c0_5, %c0_6] : memref<256x128xf32, #tpu.memory_space<vmem>>, vector<256x128xf32>
    tpu.vector_store %arg4[%c0_5, %c0_6], %10 {strides = array<i32>} : memref<256x128xf32, #tpu.memory_space<vmem>>, vector<256x128xf32>,
    return
  }
  func.func @transform_0(%arg0: i32, %arg1: i32) -> (i32, i32) {
    %c0_i32 = arith.constant 0 : i32
    return %arg0, %arg1 : i32, i32
  }
  func.func @transform_1(%arg0: i32, %arg1: i32) -> (i32, i32) {
    %c0_i32 = arith.constant 0 : i32
    %c0_i32_0 = arith.constant 0 : i32
    %c0_i32_1 = arith.constant 0 : i32
    return %c0_i32, %c0_i32_0 : i32, i32
  }
  func.func @transform_2(%arg0: i32, %arg1: i32) -> (i32, i32) {
    %c0_i32 = arith.constant 0 : i32
    %c0_i32_0 = arith.constant 0 : i32
    return %arg0, %c0_i32 : i32, i32
  }
}

module attributes {stable_mosaic.version = 11 : i64} {
  func.func @_xw_bias_kernel(%arg0: i32, %arg1: i32, %arg2: memref<256x128xf32, #tpu.memory_space<vmem>>, %arg3: memref<128x128xf32, #tpu.memory_space<vmem>>, %arg4: memref<1x128xf32, #tpu.memory_space<vmem>>, %arg5: memref<256x128xbf16, #tpu.memory_space<vmem>>, %arg6: memref<256x128xf32, #tpu.memory_space<vmem>>) attributes {dimension_semantics = [#tpu.dimension_semantics<parallel>, #tpu.dimension_semantics<arbitrary>], iteration_bounds = array<i64: 2, 1>, scalar_prefetch = 0 : i64, scratch_operands = 1 : i64, tpu.core_type = #tpu.core_type<tc>, window_params = [{transform_indices = @transform_0, window_bounds = array<i64: 256, 128>}, {transform_indices = @transform_1, window_bounds = array<i64: 128, 128>}, {pipeline_mode = #tpu.pipeline_mode<synchronous>, transform_indices = @transform_2, window_bounds = array<i64: 1, 128>}, {transform_indices = @transform_3, window_bounds = array<i64: 256, 128>}]} {
    %c0_i32 = arith.constant 0 : i32
    %0 = arith.cmpi eq, %arg1, %c0_i32 : i32
    %1 = arith.extui %0 : i1 to i32
    %c0_i32_0 = arith.constant 0 : i32
    %2 = arith.cmpi ne, %1, %c0_i32_0 : i32
    scf.if %2 {
      %cst_10 = arith.constant 0.000000e+00 : f32
      %12 = vector.broadcast %cst_10 : f32 to vector<256x128xf32>
      %c0_11 = arith.constant 0 : index
      %c0_12 = arith.constant 0 : index
      %13 = vector.load %arg6[%c0_11, %c0_12] : memref<256x128xf32, #tpu.memory_space<vmem>>, vector<256x128xf32>
      tpu.vector_store %arg6[%c0_11, %c0_12], %12 {strides = array<i32>} : memref<256x128xf32, #tpu.memory_space<vmem>>, vector<256x128xf32>,
    } else {
    }
    %c0 = arith.constant 0 : index
    %c0_1 = arith.constant 0 : index
    %3 = vector.load %arg6[%c0, %c0_1] : memref<256x128xf32, #tpu.memory_space<vmem>>, vector<256x128xf32>
    %c0_2 = arith.constant 0 : index
    %c0_3 = arith.constant 0 : index
    %4 = vector.load %arg2[%c0_2, %c0_3] : memref<256x128xf32, #tpu.memory_space<vmem>>, vector<256x128xf32>
    %c0_4 = arith.constant 0 : index
    %c0_5 = arith.constant 0 : index
    %5 = vector.load %arg3[%c0_4, %c0_5] : memref<128x128xf32, #tpu.memory_space<vmem>>, vector<128x128xf32>
    %cst = arith.constant dense<0.000000e+00> : vector<256x128xf32>
    %6 = tpu.matmul %4, %5, %cst {dimension_numbers = #tpu.dot_dimension_numbers<[1], [0], [0], [1], [0, 0, 1, 1], [], []>} : vector<256x128xf32>, vector<128x128xf32>, vector<256x128xf32> -> vector<256x128xf32>
    %7 = arith.addf %3, %6 : vector<256x128xf32>
    %c0_6 = arith.constant 0 : index
    %c0_7 = arith.constant 0 : index
    %8 = vector.load %arg6[%c0_6, %c0_7] : memref<256x128xf32, #tpu.memory_space<vmem>>, vector<256x128xf32>
    tpu.vector_store %arg6[%c0_6, %c0_7], %7 {strides = array<i32>} : memref<256x128xf32, #tpu.memory_space<vmem>>, vector<256x128xf32>,
    %c0_i32_8 = arith.constant 0 : i32
    %9 = arith.cmpi eq, %arg1, %c0_i32_8 : i32
    %10 = arith.extui %9 : i1 to i32
    %c0_i32_9 = arith.constant 0 : i32
    %11 = arith.cmpi ne, %10, %c0_i32_9 : i32
    scf.if %11 {
      %c0_10 = arith.constant 0 : index
      %c0_11 = arith.constant 0 : index
      %12 = vector.load %arg6[%c0_10, %c0_11] : memref<256x128xf32, #tpu.memory_space<vmem>>, vector<256x128xf32>
      %c0_12 = arith.constant 0 : index
      %c0_13 = arith.constant 0 : index
      %13 = vector.load %arg4[%c0_12, %c0_13] : memref<1x128xf32, #tpu.memory_space<vmem>>, vector<1x128xf32>
      %14 = vector.broadcast %13 : vector<1x128xf32> to vector<256x128xf32>
      %15 = arith.addf %12, %14 : vector<256x128xf32>
      %16 = arith.truncf %15 : vector<256x128xf32> to vector<256x128xbf16>
      %c0_14 = arith.constant 0 : index
      %c0_15 = arith.constant 0 : index
      %17 = vector.load %arg5[%c0_14, %c0_15] : memref<256x128xbf16, #tpu.memory_space<vmem>>, vector<256x128xbf16>
      tpu.vector_store %arg5[%c0_14, %c0_15], %16 {strides = array<i32>} : memref<256x128xbf16, #tpu.memory_space<vmem>>, vector<256x128xbf16>,
    } else {
    }
    return
  }
  func.func @transform_0(%arg0: i32, %arg1: i32) -> (i32, i32) {
    %c0_i32 = arith.constant 0 : i32
    return %arg0, %arg1 : i32, i32
  }
  func.func @transform_1(%arg0: i32, %arg1: i32) -> (i32, i32) {
    %c0_i32 = arith.constant 0 : i32
    %c0_i32_0 = arith.constant 0 : i32
    return %arg1, %c0_i32 : i32, i32
  }
  func.func @transform_2(%arg0: i32, %arg1: i32) -> (i32, i32) {
    %c0_i32 = arith.constant 0 : i32
    %c0_i32_0 = arith.constant 0 : i32
    %c0_i32_1 = arith.constant 0 : i32
    return %c0_i32, %c0_i32_0 : i32, i32
  }
  func.func @transform_3(%arg0: i32, %arg1: i32) -> (i32, i32) {
    %c0_i32 = arith.constant 0 : i32
    %c0_i32_0 = arith.constant 0 : i32
    return %arg0, %c0_i32 : i32, i32
  }
}

</mosaic_0001>

<bundles_post_ra>
// kernel: hgnn_conv.2
= control target key start
LH: loop header
LB: loop body
LE: loop exit
PB: predicated region body
PF: predicated region fallthrough
CT: control target
= control target key end

     0   :  { %s1357_s12 = smov 0   ;;  %s1359_s13 = smov 0   ;;  %s1531_s0 = inlined_call_operand.vmem [shape: f32[512,128], index: 0, kind: input, shape index: {}]   ;;  %s1532_s1 = inlined_call_operand.vmem [shape: f32[128,128], index: 1, kind: input, shape index: {}]   ;;  %s1533_s2 = inlined_call_operand.vmem [shape: f32[1,128], index: 2, kind: input, shape index: {}]   ;;  %s1534_s3 = inlined_call_operand.vmem [shape: bf16[512,128], index: 3, kind: output, shape index: {}]  }
   0x1   :  { %s1361_s14 = smov 0  }
   0x2 LB: > { %s25_s15 = sadd.s32 1, %s1331_s13  ;;  %p946_p0 = scmp.ge.s32.totalorder %s1335_s14, 1  ;;  %s1335_s14 = sphi %s1361_s14, %s13_s14   ;;  %s1331_s13 = sphi %s1359_s13, %s1536_s13   ;;  %s1327_s12 = sphi %s1357_s12, %s1535_s12  }
   0x3   : > { %p27_p1 = scmp.ge.s32.totalorder %s25_s15, 2  ;;  %p166_p2 = scmp.lt.s32.totalorder %s1335_s14, 3 }
   0x5   : > { %s1538_s15 = smov (%p27_p1, %s25_s15), 0  ;;  %p167_p3 = pnand %p946_p0, %p166_p2 }
   0x6   : > { %v319_v0 = vld [vmem:[%s1532_s1] sm:$0xff] (!%p167_p3)  ;;  %v320_v1 = vld [vmem:[%s1532_s1 + $0x8] sm:$0xff] (!%p167_p3)  ;;  %v321_v2 = vld [vmem:[%s1532_s1 + $0x10] sm:$0xff] (!%p167_p3)  ;;  %s947_s22 = sshll.u32 (!%p167_p3), %s1327_s12, 5 }
   0x7   : > { %170 = sbr.rel (%p167_p3) target bundleno = 288 (0x120), region = 32  ;;  %v1241_v3 = vpack.c.bf16 (!%p167_p3), %v320_v1, %v319_v0  ;;  %v322_v4 = vld [vmem:[%s1532_s1 + $0x18] sm:$0xff] (!%p167_p3)  ;;  %p199_p4 = scmp.lt.s32.totalorder (!%p167_p3), %s947_s22, 63  ;;  %v323_v6 = vld [vmem:[%s1532_s1 + $0x20] sm:$0xff] (!%p167_p3)  ;;  %v324_v7 = vld [vmem:[%s1532_s1 + $0x28] sm:$0xff] (!%p167_p3) }
   0x8   : > { %v1245_v5 = vpack.c.bf16 (!%p167_p3), %v322_v4, %v321_v2  ;;  %v1249_v8 = vpack.c.bf16 (!%p167_p3), %v324_v7, %v323_v6  ;;  %v325_v9 = vld [vmem:[%s1532_s1 + $0x30] sm:$0xff] (!%p167_p3)  ;;  %v326_v10 = vld [vmem:[%s1532_s1 + $0x38] sm:$0xff] (!%p167_p3)  ;;  %v327_v14 = vld [vmem:[%s1532_s1 + $0x40] sm:$0xff] (!%p167_p3) }
   0x9   : > { %1242 = vmatprep.subr.bf16.mxu0 (!%p167_p3), %v1241_v3  ;;  %1273 = vmatprep.subr.bf16.mxu1 (!%p167_p3), %v1241_v3  ;;  %v1253_v13 = vpack.c.bf16 (!%p167_p3), %v326_v10, %v325_v9  ;;  %v328_v15 = vld [vmem:[%s1532_s1 + $0x48] sm:$0xff] (!%p167_p3)  ;;  %v329_v17 = vld [vmem:[%s1532_s1 + $0x50] sm:$0xff] (!%p167_p3)  ;;  %v330_v18 = vld [vmem:[%s1532_s1 + $0x58] sm:$0xff] (!%p167_p3) }
   0xa   : > { %1244 = vmatpush3.bf16.msra.mxu0 (!%p167_p3), %v1241_v3  ;;  %1281 = vmatpush3.bf16.msra.mxu1 (!%p167_p3), %v1241_v3  ;;  %v1257_v16 = vpack.c.bf16 (!%p167_p3), %v328_v15, %v327_v14  ;;  %v1261_v19 = vpack.c.bf16 (!%p167_p3), %v330_v18, %v329_v17  ;;  %v331_v20 = vld [vmem:[%s1532_s1 + $0x60] sm:$0xff] (!%p167_p3)  ;;  %v332_v21 = vld [vmem:[%s1532_s1 + $0x68] sm:$0xff] (!%p167_p3)  ;;  %v333_v23 = vld [vmem:[%s1532_s1 + $0x70] sm:$0xff] (!%p167_p3) }
   0xb   : > { %1246 = vmatprep.subr.bf16.mxu0 (!%p167_p3), %v1245_v5  ;;  %1274 = vmatprep.subr.bf16.mxu1 (!%p167_p3), %v1245_v5  ;;  %v1265_v22 = vpack.c.bf16 (!%p167_p3), %v332_v21, %v331_v20  ;;  %v334_v24 = vld [vmem:[%s1532_s1 + $0x78] sm:$0xff] (!%p167_p3)  ;;  %v1466_v56 = vld [vmem:[%s1533_s2] ss:$0 sm:$0xff] (!%p167_p3) }
   0xc   : > { %v1269_v25 = vpack.c.bf16 (!%p167_p3), %v334_v24, %v333_v23 }
   0xe   : > { %s1540_s22 = smov (!%p199_p4, %s947_s22), 63  ;;  %1248 = vmatpush3.bf16.msra.mxu0 %v1245_v5  ;;  %1282 = vmatpush3.bf16.msra.mxu1 %v1245_v5 }
   0xf   : > { %s948_s29 = sshll.u32 %s1540_s22, 3  ;;  %1250 = vmatprep.subr.bf16.mxu0 %v1249_v8  ;;  %1275 = vmatprep.subr.bf16.mxu1 %v1249_v8  ;;  %s950_s5 = sshll.u32 %s1540_s22, 2 }
  0x10   : > { %s1405_s9 = scalar_lea.vmem %s1531_s0, %s948_s29  ;;  %s1476_s8 = scalar_lea.vmem %s1534_s3, %s950_s5 }
  0x11   : > { %v287_v11 = vld [vmem:[%s1405_s9] sm:$0xff]  ;;  %v288_v26 = vld [vmem:[%s1405_s9 + $0x8] sm:$0xff]  ;;  %v289_v28 = vld [vmem:[%s1405_s9 + $0x10] sm:$0xff] }
  0x12   : > { %v303_v12 = vld [vmem:[%s1405_s9 + $0x80] sm:$0xff]  ;;  %1193 = vmatprep.mubr.f32.mxu0 %v287_v11  ;;  %1252 = vmatpush3.bf16.msra.mxu0 %v1249_v8  ;;  %v304_v27 = vld [vmem:[%s1405_s9 + $0x88] sm:$0xff]  ;;  %v305_v29 = vld [vmem:[%s1405_s9 + $0x90] sm:$0xff] }
  0x13   : > { %1217 = vmatprep.mubr.f32.mxu1 %v303_v12  ;;  %1283 = vmatpush3.bf16.msra.mxu1 %v1249_v8  ;;  %v290_v30 = vld [vmem:[%s1405_s9 + $0x18] sm:$0xff]  ;;  %v291_v32 = vld [vmem:[%s1405_s9 + $0x20] sm:$0xff]  ;;  %v292_v34 = vld [vmem:[%s1405_s9 + $0x28] sm:$0xff] }
  0x14   : > { %1254 = vmatprep.subr.bf16.mxu0 %v1253_v13  ;;  %1276 = vmatprep.subr.bf16.mxu1 %v1253_v13  ;;  %v306_v31 = vld [vmem:[%s1405_s9 + $0x98] sm:$0xff]  ;;  %v307_v33 = vld [vmem:[%s1405_s9 + $0xa0] sm:$0xff]  ;;  %v308_v35 = vld [vmem:[%s1405_s9 + $0xa8] sm:$0xff] }
  0x15   : > { %v293_v36 = vld [vmem:[%s1405_s9 + $0x30] sm:$0xff]  ;;  %v294_v38 = vld [vmem:[%s1405_s9 + $0x38] sm:$0xff]  ;;  %v295_v40 = vld [vmem:[%s1405_s9 + $0x40] sm:$0xff] }
  0x16   : > { %1256 = vmatpush3.bf16.msra.mxu0 %v1253_v13  ;;  %v309_v37 = vld [vmem:[%s1405_s9 + $0xb0] sm:$0xff]  ;;  %v310_v39 = vld [vmem:[%s1405_s9 + $0xb8] sm:$0xff]  ;;  %v311_v41 = vld [vmem:[%s1405_s9 + $0xc0] sm:$0xff] }
  0x17   : > { %1284 = vmatpush3.bf16.msra.mxu1 %v1253_v13  ;;  %1258 = vmatprep.subr.bf16.mxu0 %v1257_v16  ;;  %v296_v42 = vld [vmem:[%s1405_s9 + $0x48] sm:$0xff]  ;;  %v297_v44 = vld [vmem:[%s1405_s9 + $0x50] sm:$0xff]  ;;  %v298_v46 = vld [vmem:[%s1405_s9 + $0x58] sm:$0xff] }
  0x18   : > { %1277 = vmatprep.subr.bf16.mxu1 %v1257_v16  ;;  %v312_v43 = vld [vmem:[%s1405_s9 + $0xc8] sm:$0xff]  ;;  %v313_v45 = vld [vmem:[%s1405_s9 + $0xd0] sm:$0xff]  ;;  %v314_v47 = vld [vmem:[%s1405_s9 + $0xd8] sm:$0xff] }
  0x19   : > { %v299_v48 = vld [vmem:[%s1405_s9 + $0x60] sm:$0xff]  ;;  %v300_v50 = vld [vmem:[%s1405_s9 + $0x68] sm:$0xff]  ;;  %v301_v52 = vld [vmem:[%s1405_s9 + $0x70] sm:$0xff] }
  0x1a   : > { %1260 = vmatpush3.bf16.msra.mxu0 %v1257_v16  ;;  %v315_v49 = vld [vmem:[%s1405_s9 + $0xe0] sm:$0xff]  ;;  %v316_v51 = vld [vmem:[%s1405_s9 + $0xe8] sm:$0xff]  ;;  %v317_v53 = vld [vmem:[%s1405_s9 + $0xf0] sm:$0xff] }
  0x1b   : > { %1285 = vmatpush3.bf16.msra.mxu1 %v1257_v16  ;;  %1262 = vmatprep.subr.bf16.mxu0 %v1261_v19  ;;  %v302_v54 = vld [vmem:[%s1405_s9 + $0x78] sm:$0xff] }
  0x1c   : > { %1278 = vmatprep.subr.bf16.mxu1 %v1261_v19  ;;  %v318_v55 = vld [vmem:[%s1405_s9 + $0xf8] sm:$0xff] }
  0x1e   : > { %1264 = vmatpush3.bf16.msra.mxu0 %v1261_v19 }
  0x1f   : > { %1286 = vmatpush3.bf16.msra.mxu1 %v1261_v19  ;;  %1266 = vmatprep.subr.bf16.mxu0 %v1265_v22 }
  0x20   : > { %1279 = vmatprep.subr.bf16.mxu1 %v1265_v22 }
  0x22   : > { %1268 = vmatpush3.bf16.msra.mxu0 %v1265_v22 }
  0x23   : > { %1287 = vmatpush3.bf16.msra.mxu1 %v1265_v22  ;;  %1270 = vmatprep.subr.bf16.mxu0 %v1269_v25 }
  0x24   : > { %1280 = vmatprep.subr.bf16.mxu1 %v1269_v25 }
  0x26   : > { %1272 = vmatpush3.bf16.msra.mxu0 %v1269_v25 }
  0x27   : > { %1288 = vmatpush3.bf16.msra.mxu1 %v1269_v25 }
  0x29   : > { %1194 = vmatmul.mubr.f32.vlgmr.msra.gmra.mrb[0].mxu0 %v288_v26 }
  0x2a   : > { %1218 = vmatmul.mubr.f32.vlgmr.msra.gmra.mrb[0].mxu1 %v304_v27  ;;  %1196 = vmatprep.mubr.f32.mxu0 %v289_v28 }
  0x2b   : > { %1220 = vmatprep.mubr.f32.mxu1 %v305_v29 }
  0x2d   : > { %1197 = vmatmul.mubr.f32.gmra.mrb[2].mxu0 %v290_v30 }
  0x2e   : > { %1221 = vmatmul.mubr.f32.gmra.mrb[2].mxu1 %v306_v31  ;;  %1199 = vmatprep.mubr.f32.mxu0 %v291_v32 }
  0x2f   : > { %1223 = vmatprep.mubr.f32.mxu1 %v307_v33 }
  0x31   : > { %1200 = vmatmul.mubr.f32.gmra.mrb[4].mxu0 %v292_v34 }
  0x32   : > { %1224 = vmatmul.mubr.f32.gmra.mrb[4].mxu1 %v308_v35  ;;  %1202 = vmatprep.mubr.f32.mxu0 %v293_v36 }
  0x33   : > { %1226 = vmatprep.mubr.f32.mxu1 %v309_v37 }
  0x35   : > { %1203 = vmatmul.mubr.f32.gmra.mrb[6].mxu0 %v294_v38 }
  0x36   : > { %1227 = vmatmul.mubr.f32.gmra.mrb[6].mxu1 %v310_v39  ;;  %1205 = vmatprep.mubr.f32.mxu0 %v295_v40 }
  0x37   : > { %1229 = vmatprep.mubr.f32.mxu1 %v311_v41 }
  0x39   : > { %1206 = vmatmul.mubr.f32.gmra.mrb[8].mxu0 %v296_v42 }
  0x3a   : > { %1230 = vmatmul.mubr.f32.gmra.mrb[8].mxu1 %v312_v43  ;;  %1208 = vmatprep.mubr.f32.mxu0 %v297_v44 }
  0x3b   : > { %1232 = vmatprep.mubr.f32.mxu1 %v313_v45 }
  0x3d   : > { %1209 = vmatmul.mubr.f32.gmra.mrb[10].mxu0 %v298_v46 }
  0x3e   : > { %1233 = vmatmul.mubr.f32.gmra.mrb[10].mxu1 %v314_v47  ;;  %1211 = vmatprep.mubr.f32.mxu0 %v299_v48 }
  0x3f   : > { %1235 = vmatprep.mubr.f32.mxu1 %v315_v49 }
  0x41   : > { %1212 = vmatmul.mubr.f32.gmra.mrb[12].mxu0 %v300_v50 }
  0x42   : > { %1236 = vmatmul.mubr.f32.gmra.mrb[12].mxu1 %v316_v51  ;;  %1214 = vmatprep.mubr.f32.mxu0 %v301_v52 }
  0x43   : > { %1238 = vmatprep.mubr.f32.mxu1 %v317_v53 }
  0x45   : > { %1215 = vmatmul.mubr.f32.gmra.mrb[14].mxu0 %v302_v54 }
  0x46   : > { %1239 = vmatmul.mubr.f32.gmra.mrb[14].mxu1 %v318_v55 }
  0xfc   : > { %v1195_v57 = vpop.f32.mrb[0].mxu0 }
  0xfd   : > { %v1219_v58 = vpop.f32.mrb[0].mxu1  ;;  %v667_v59 = vadd.f32 %v1195_v57, %v1466_v56  ;;  %v401_v61 = vpop.f32.mrb[1].mxu0 }
  0xfe   : > { %v683_v60 = vadd.f32 %v1219_v58, %v1466_v56  ;;  %v481_v62 = vpop.f32.mrb[1].mxu1  ;;  %v666_v63 = vadd.f32 %v1466_v56, %v401_v61 }
  0xff   : > { %v682_v0 = vadd.f32 %v1466_v56, %v481_v62 }
 0x100   : > { %v1021_v1 = vpack.c.bf16 %v667_v59, %v666_v63  ;;  %v1198_v3 = vpop.f32.mrb[2].mxu0 }
 0x101   : > { %v1061_v2 = vpack.c.bf16 %v683_v60, %v682_v0  ;;  %v1222_v4 = vpop.f32.mrb[2].mxu1  ;;  %v669_v5 = vadd.f32 %v1198_v3, %v1466_v56  ;;  %v411_v7 = vpop.f32.mrb[3].mxu0 }
 0x102   : > { %v685_v6 = vadd.f32 %v1222_v4, %v1466_v56  ;;  %v491_v8 = vpop.f32.mrb[3].mxu1  ;;  %1022 = vst [vmem:[%s1476_s8] sm:$0xff] %v1021_v1   ;;  %v668_v9 = vadd.f32 %v1466_v56, %v411_v7 }
 0x103   : > { %1105 = vst [vmem:[%s1476_s8 + $0x40] sm:$0xff] %v1061_v2   ;;  %v684_v10 = vadd.f32 %v1466_v56, %v491_v8 }
 0x104   : > { %v1026_v11 = vpack.c.bf16 %v669_v5, %v668_v9  ;;  %v1201_v13 = vpop.f32.mrb[4].mxu0 }
 0x105   : > { %v1066_v12 = vpack.c.bf16 %v685_v6, %v684_v10  ;;  %v1225_v14 = vpop.f32.mrb[4].mxu1  ;;  %v671_v15 = vadd.f32 %v1201_v13, %v1466_v56  ;;  %v421_v17 = vpop.f32.mrb[5].mxu0 }
 0x106   : > { %v687_v16 = vadd.f32 %v1225_v14, %v1466_v56  ;;  %v501_v18 = vpop.f32.mrb[5].mxu1  ;;  %1098 = vst [vmem:[%s1476_s8 + $0x8] sm:$0xff] %v1026_v11   ;;  %v670_v19 = vadd.f32 %v1466_v56, %v421_v17 }
 0x107   : > { %1106 = vst [vmem:[%s1476_s8 + $0x48] sm:$0xff] %v1066_v12   ;;  %v686_v20 = vadd.f32 %v1466_v56, %v501_v18 }
 0x108   : > { %v1031_v21 = vpack.c.bf16 %v671_v15, %v670_v19  ;;  %v1204_v23 = vpop.f32.mrb[6].mxu0 }
 0x109   : > { %v1071_v22 = vpack.c.bf16 %v687_v16, %v686_v20  ;;  %v1228_v24 = vpop.f32.mrb[6].mxu1  ;;  %v673_v25 = vadd.f32 %v1204_v23, %v1466_v56  ;;  %v431_v27 = vpop.f32.mrb[7].mxu0 }
 0x10a   : > { %v689_v26 = vadd.f32 %v1228_v24, %v1466_v56  ;;  %v511_v28 = vpop.f32.mrb[7].mxu1  ;;  %1099 = vst [vmem:[%s1476_s8 + $0x10] sm:$0xff] %v1031_v21   ;;  %v672_v29 = vadd.f32 %v1466_v56, %v431_v27 }
 0x10b   : > { %1107 = vst [vmem:[%s1476_s8 + $0x50] sm:$0xff] %v1071_v22   ;;  %v688_v30 = vadd.f32 %v1466_v56, %v511_v28 }
 0x10c   : > { %v1036_v31 = vpack.c.bf16 %v673_v25, %v672_v29  ;;  %v1207_v33 = vpop.f32.mrb[8].mxu0 }
 0x10d   : > { %v1076_v32 = vpack.c.bf16 %v689_v26, %v688_v30  ;;  %v1231_v34 = vpop.f32.mrb[8].mxu1  ;;  %v675_v35 = vadd.f32 %v1207_v33, %v1466_v56  ;;  %v441_v37 = vpop.f32.mrb[9].mxu0 }
 0x10e   : > { %v691_v36 = vadd.f32 %v1231_v34, %v1466_v56  ;;  %v521_v38 = vpop.f32.mrb[9].mxu1  ;;  %1100 = vst [vmem:[%s1476_s8 + $0x18] sm:$0xff] %v1036_v31   ;;  %v674_v39 = vadd.f32 %v1466_v56, %v441_v37 }
 0x10f   : > { %1108 = vst [vmem:[%s1476_s8 + $0x58] sm:$0xff] %v1076_v32   ;;  %v690_v40 = vadd.f32 %v1466_v56, %v521_v38 }
 0x110   : > { %v1041_v41 = vpack.c.bf16 %v675_v35, %v674_v39  ;;  %v1210_v43 = vpop.f32.mrb[10].mxu0 }
 0x111   : > { %v1081_v42 = vpack.c.bf16 %v691_v36, %v690_v40  ;;  %v1234_v44 = vpop.f32.mrb[10].mxu1  ;;  %v677_v45 = vadd.f32 %v1210_v43, %v1466_v56  ;;  %v451_v47 = vpop.f32.mrb[11].mxu0 }
 0x112   : > { %v693_v46 = vadd.f32 %v1234_v44, %v1466_v56  ;;  %v531_v48 = vpop.f32.mrb[11].mxu1  ;;  %1101 = vst [vmem:[%s1476_s8 + $0x20] sm:$0xff] %v1041_v41   ;;  %v676_v49 = vadd.f32 %v1466_v56, %v451_v47 }
 0x113   : > { %1109 = vst [vmem:[%s1476_s8 + $0x60] sm:$0xff] %v1081_v42   ;;  %v692_v50 = vadd.f32 %v1466_v56, %v531_v48 }
 0x114   : > { %v1046_v51 = vpack.c.bf16 %v677_v45, %v676_v49  ;;  %v1213_v53 = vpop.f32.mrb[12].mxu0 }
 0x115   : > { %v1086_v52 = vpack.c.bf16 %v693_v46, %v692_v50  ;;  %v1237_v54 = vpop.f32.mrb[12].mxu1  ;;  %v679_v55 = vadd.f32 %v1213_v53, %v1466_v56  ;;  %v461_v58 = vpop.f32.mrb[13].mxu0 }
 0x116   : > { %v695_v57 = vadd.f32 %v1237_v54, %v1466_v56  ;;  %v541_v59 = vpop.f32.mrb[13].mxu1  ;;  %1102 = vst [vmem:[%s1476_s8 + $0x28] sm:$0xff] %v1046_v51   ;;  %v678_v60 = vadd.f32 %v1466_v56, %v461_v58 }
 0x117   : > { %1110 = vst [vmem:[%s1476_s8 + $0x68] sm:$0xff] %v1086_v52   ;;  %v694_v61 = vadd.f32 %v1466_v56, %v541_v59 }
 0x118   : > { %v1051_v62 = vpack.c.bf16 %v679_v55, %v678_v60  ;;  %v1216_v0 = vpop.f32.mrb[14].mxu0 }
 0x119   : > { %v1091_v63 = vpack.c.bf16 %v695_v57, %v694_v61  ;;  %v1240_v1 = vpop.f32.mrb[14].mxu1  ;;  %v681_v2 = vadd.f32 %v1216_v0, %v1466_v56  ;;  %v471_v4 = vpop.f32.mrb[15].mxu0 }
 0x11a   : > { %v697_v3 = vadd.f32 %v1240_v1, %v1466_v56  ;;  %v551_v5 = vpop.f32.mrb[15].mxu1  ;;  %1103 = vst [vmem:[%s1476_s8 + $0x30] sm:$0xff] %v1051_v62   ;;  %v680_v6 = vadd.f32 %v1466_v56, %v471_v4 }
 0x11b   : > { %1111 = vst [vmem:[%s1476_s8 + $0x70] sm:$0xff] %v1091_v63   ;;  %v696_v7 = vadd.f32 %v1466_v56, %v551_v5 }
 0x11c   : > { %v1056_v8 = vpack.c.bf16 %v681_v2, %v680_v6 }
 0x11d   : > { %v1096_v9 = vpack.c.bf16 %v697_v3, %v696_v7 }
 0x11e   : > { %1104 = vst [vmem:[%s1476_s8 + $0x38] sm:$0xff] %v1056_v8  }
 0x11f   : > { %1112 = vst [vmem:[%s1476_s8 + $0x78] sm:$0xff] %v1096_v9  }
 0x120 PF: > { %s13_s14 = sadd.s32 1, %s1335_s14   ;;  %s1535_s12 = smov %s1331_s13 }
 0x121   : > { %p10_p5 = scmp.ge.s32.totalorder %s13_s14, 4   ;;  %s1536_s13 = smov %s1538_s15 }
 0x123   :  { %12 = sbr.rel (!%p10_p5) target bundleno = 2 (0x2), region = 73 }

// kernel: hgnn_conv.3
= control target key start
LH: loop header
LB: loop body
LE: loop exit
PB: predicated region body
PF: predicated region fallthrough
CT: control target
= control target key end

     0   :  { %s1876_s9 = smov 0   ;;  %s1878_s10 = smov 0   ;;  %s2112_s0 = inlined_call_operand.vmem [shape: bf16[512,512], index: 0, kind: input, shape index: {}]   ;;  %s2113_s1 = inlined_call_operand.vmem [shape: bf16[512,128], index: 1, kind: input, shape index: {}]   ;;  %s2114_s2 = inlined_call_operand.vmem [shape: f32[512,128], index: 2, kind: output, shape index: {}]  }
   0x1   :  { %s1880_s11 = smov 0  }
   0x2 LB: > { %s24_s12 = sadd.s32 1, %s1855_s10  ;;  %p1355_p0 = scmp.ge.s32.totalorder %s1859_s11, 1  ;;  %s1859_s11 = sphi %s1880_s11, %s12_s11   ;;  %s1855_s10 = sphi %s1878_s10, %s2116_s10   ;;  %s1851_s9 = sphi %s1876_s9, %s2115_s9  }
   0x3   : > { %p26_p1 = scmp.ge.s32.totalorder %s24_s12, 2  ;;  %p133_p2 = scmp.lt.s32.totalorder %s1859_s11, 3 }
   0x5   : > { %s2118_s12 = smov (%p26_p1, %s24_s12), 0  ;;  %p134_p3 = pnand %p1355_p0, %p133_p2 }
   0x6   : > { %v1709_v0 = vld [vmem:[%s2113_s1 + $0x40] sm:$0xff] (!%p134_p3)   ;;  %v1713_v4 = vld [vmem:[%s2113_s1 + $0x48] sm:$0xff] (!%p134_p3)   ;;  %v1717_v8 = vld [vmem:[%s2113_s1 + $0x50] sm:$0xff] (!%p134_p3)   ;;  %s1356_s21 = sshll.u32 (!%p134_p3), %s1851_s9, 5 }
   0x7   : > { %137 = sbr.rel (%p134_p3) target bundleno = 381 (0x17d), region = 28  ;;  %v1710_v1 = vld [vmem:[%s2113_s1 + $0xc0] sm:$0xff] (!%p134_p3)   ;;  %1460 = vmatprep.subr.bf16.mxu0 (!%p134_p3), %v1709_v0  ;;  %v1714_v5 = vld [vmem:[%s2113_s1 + $0xc8] sm:$0xff] (!%p134_p3)   ;;  %v1718_v9 = vld [vmem:[%s2113_s1 + $0xd0] sm:$0xff] (!%p134_p3)   ;;  %p162_p4 = scmp.lt.s32.totalorder (!%p134_p3), %s1356_s21, 63 }
   0x8   : > { %v1711_v2 = vld [vmem:[%s2113_s1] sm:$0xff] (!%p134_p3)   ;;  %1572 = vmatprep.subr.bf16.mxu1 (!%p134_p3), %v1710_v1  ;;  %v1715_v6 = vld [vmem:[%s2113_s1 + $0x8] sm:$0xff] (!%p134_p3)   ;;  %v1719_v10 = vld [vmem:[%s2113_s1 + $0x10] sm:$0xff] (!%p134_p3)  }
   0x9   : > { %v1712_v3 = vld [vmem:[%s2113_s1 + $0x80] sm:$0xff] (!%p134_p3)   ;;  %1461 = vmatpush3.bf16.msra.mxu0 (!%p134_p3), %v1711_v2  ;;  %v1716_v7 = vld [vmem:[%s2113_s1 + $0x88] sm:$0xff] (!%p134_p3)   ;;  %v1720_v11 = vld [vmem:[%s2113_s1 + $0x90] sm:$0xff] (!%p134_p3)  }
   0xa   : > { %1573 = vmatpush3.bf16.msra.mxu1 (!%p134_p3), %v1712_v3  ;;  %1462 = vmatprep.subr.bf16.mxu0 (!%p134_p3), %v1713_v4  ;;  %v1721_v12 = vld [vmem:[%s2113_s1 + $0x58] sm:$0xff] (!%p134_p3)   ;;  %v1725_v16 = vld [vmem:[%s2113_s1 + $0x60] sm:$0xff] (!%p134_p3)   ;;  %v1729_v20 = vld [vmem:[%s2113_s1 + $0x68] sm:$0xff] (!%p134_p3)  }
   0xb   : > { %1574 = vmatprep.subr.bf16.mxu1 (!%p134_p3), %v1714_v5  ;;  %v1722_v13 = vld [vmem:[%s2113_s1 + $0xd8] sm:$0xff] (!%p134_p3)   ;;  %v1726_v17 = vld [vmem:[%s2113_s1 + $0xe0] sm:$0xff] (!%p134_p3)   ;;  %v1730_v21 = vld [vmem:[%s2113_s1 + $0xe8] sm:$0xff] (!%p134_p3)  }
   0xc   : > { %v1723_v14 = vld [vmem:[%s2113_s1 + $0x18] sm:$0xff] (!%p134_p3)   ;;  %v1727_v18 = vld [vmem:[%s2113_s1 + $0x20] sm:$0xff] (!%p134_p3)   ;;  %v1731_v22 = vld [vmem:[%s2113_s1 + $0x28] sm:$0xff] (!%p134_p3)  }
   0xd   : > { %1463 = vmatpush3.bf16.msra.mxu0 (!%p134_p3), %v1715_v6  ;;  %v1724_v15 = vld [vmem:[%s2113_s1 + $0x98] sm:$0xff] (!%p134_p3)   ;;  %v1728_v19 = vld [vmem:[%s2113_s1 + $0xa0] sm:$0xff] (!%p134_p3)   ;;  %v1732_v23 = vld [vmem:[%s2113_s1 + $0xa8] sm:$0xff] (!%p134_p3)  }
   0xe   : > { %1575 = vmatpush3.bf16.msra.mxu1 %v1716_v7  ;;  %1464 = vmatprep.subr.bf16.mxu0 %v1717_v8  ;;  %s2120_s21 = smov (!%p162_p4, %s1356_s21), 63  ;;  %v1733_v24 = vld [vmem:[%s2113_s1 + $0x70] sm:$0xff]   ;;  %v1737_v28 = vld [vmem:[%s2113_s1 + $0x78] sm:$0xff]  }
   0xf   : > { %1576 = vmatprep.subr.bf16.mxu1 %v1718_v9  ;;  %v1734_v25 = vld [vmem:[%s2113_s1 + $0xf0] sm:$0xff]   ;;  %s1459_s19 = sshll.u32 %s2120_s21, 4  ;;  %v1738_v29 = vld [vmem:[%s2113_s1 + $0xf8] sm:$0xff]   ;;  %s1360_s5 = sshll.u32 %s2120_s21, 3 }
  0x10   : > { %v1735_v26 = vld [vmem:[%s2113_s1 + $0x30] sm:$0xff]   ;;  %s1993_s29 = scalar_lea.vmem %s2112_s0, %s1459_s19  ;;  %v1739_v30 = vld [vmem:[%s2113_s1 + $0x38] sm:$0xff]   ;;  %s2069_s8 = scalar_lea.vmem %s2114_s2, %s1360_s5 }
  0x11   : > { %1465 = vmatpush3.bf16.msra.mxu0 %v1719_v10  ;;  %v1736_v27 = vld [vmem:[%s2113_s1 + $0xb0] sm:$0xff]   ;;  %v1740_v31 = vld [vmem:[%s2113_s1 + $0xb8] sm:$0xff]  }
  0x12   : > { %1577 = vmatpush3.bf16.msra.mxu1 %v1720_v11  ;;  %1466 = vmatprep.subr.bf16.mxu0 %v1721_v12  ;;  %v1741_v32 = vld [vmem:[%s1993_s29] ss:$16 sps:$4 sm:$0xff]   ;;  %v1743_v33 = vld [vmem:[%s1993_s29 + $0x4] ss:$16 sps:$4 sm:$0xff]   ;;  %v1744_v34 = vld [vmem:[%s1993_s29 + $0x8] ss:$16 sps:$4 sm:$0xff]  }
  0x13   : > { %1578 = vmatprep.subr.bf16.mxu1 %v1722_v13  ;;  %v1746_v35 = vld [vmem:[%s1993_s29 + $0xc] ss:$16 sps:$4 sm:$0xff]   ;;  %924 = vmatprep.mubr.bf16.mxu0 %v1743_v33  ;;  %v1747_v36 = vld [vmem:[%s1993_s29 + $0x24] ss:$16 sps:$4 sm:$0xff]   ;;  %v1751_v38 = vld [vmem:[%s1993_s29 + $0x20] ss:$16 sps:$4 sm:$0xff]  }
  0x14   : > { %1085 = vmatprep.mubr.bf16.mxu1 %v1746_v35  ;;  %v1749_v37 = vld [vmem:[%s1993_s29 + $0x2c] ss:$16 sps:$4 sm:$0xff]   ;;  %v1752_v39 = vld [vmem:[%s1993_s29 + $0x28] ss:$16 sps:$4 sm:$0xff]   ;;  %v1753_v40 = vld [vmem:[%s1993_s29 + $0x44] ss:$16 sps:$4 sm:$0xff]  }
  0x15   : > { %1467 = vmatpush3.bf16.msra.mxu0 %v1723_v14  ;;  %v1755_v41 = vld [vmem:[%s1993_s29 + $0x4c] ss:$16 sps:$4 sm:$0xff]   ;;  %v1757_v42 = vld [vmem:[%s1993_s29 + $0x40] ss:$16 sps:$4 sm:$0xff]   ;;  %v1758_v43 = vld [vmem:[%s1993_s29 + $0x48] ss:$16 sps:$4 sm:$0xff]  }
  0x16   : > { %1579 = vmatpush3.bf16.msra.mxu1 %v1724_v15  ;;  %1468 = vmatprep.subr.bf16.mxu0 %v1725_v16  ;;  %v1759_v44 = vld [vmem:[%s1993_s29 + $0x64] ss:$16 sps:$4 sm:$0xff]   ;;  %v1761_v45 = vld [vmem:[%s1993_s29 + $0x6c] ss:$16 sps:$4 sm:$0xff]   ;;  %v1763_v46 = vld [vmem:[%s1993_s29 + $0x60] ss:$16 sps:$4 sm:$0xff]  }
  0x17   : > { %1580 = vmatprep.subr.bf16.mxu1 %v1726_v17  ;;  %v1764_v47 = vld [vmem:[%s1993_s29 + $0x68] ss:$16 sps:$4 sm:$0xff]   ;;  %v1765_v48 = vld [vmem:[%s1993_s29 + $0x84] ss:$16 sps:$4 sm:$0xff]   ;;  %v1767_v49 = vld [vmem:[%s1993_s29 + $0x8c] ss:$16 sps:$4 sm:$0xff]  }
  0x18   : > { %v1769_v50 = vld [vmem:[%s1993_s29 + $0x80] ss:$16 sps:$4 sm:$0xff]   ;;  %v1770_v51 = vld [vmem:[%s1993_s29 + $0x88] ss:$16 sps:$4 sm:$0xff]   ;;  %v1771_v52 = vld [vmem:[%s1993_s29 + $0xa4] ss:$16 sps:$4 sm:$0xff]  }
  0x19   : > { %1469 = vmatpush3.bf16.msra.mxu0 %v1727_v18  ;;  %v1773_v53 = vld [vmem:[%s1993_s29 + $0xac] ss:$16 sps:$4 sm:$0xff]   ;;  %v1775_v54 = vld [vmem:[%s1993_s29 + $0xa0] ss:$16 sps:$4 sm:$0xff]   ;;  %v1776_v55 = vld [vmem:[%s1993_s29 + $0xa8] ss:$16 sps:$4 sm:$0xff]  }
  0x1a   : > { %1581 = vmatpush3.bf16.msra.mxu1 %v1728_v19  ;;  %1470 = vmatprep.subr.bf16.mxu0 %v1729_v20  ;;  %v1777_v56 = vld [vmem:[%s1993_s29 + $0xc4] ss:$16 sps:$4 sm:$0xff]   ;;  %v1779_v57 = vld [vmem:[%s1993_s29 + $0xcc] ss:$16 sps:$4 sm:$0xff]   ;;  %v1781_v58 = vld [vmem:[%s1993_s29 + $0xc0] ss:$16 sps:$4 sm:$0xff]  }
  0x1b   : > { %1582 = vmatprep.subr.bf16.mxu1 %v1730_v21  ;;  %v1782_v59 = vld [vmem:[%s1993_s29 + $0xc8] ss:$16 sps:$4 sm:$0xff]   ;;  %v1783_v60 = vld [vmem:[%s1993_s29 + $0xe4] ss:$16 sps:$4 sm:$0xff]   ;;  %v1785_v61 = vld [vmem:[%s1993_s29 + $0xec] ss:$16 sps:$4 sm:$0xff]  }
  0x1c   : > { %v1787_v62 = vld [vmem:[%s1993_s29 + $0xe0] ss:$16 sps:$4 sm:$0xff]   ;;  %v1788_v63 = vld [vmem:[%s1993_s29 + $0xe8] ss:$16 sps:$4 sm:$0xff]   ;;  %v1789_v0 = vld [vmem:[%s1993_s29 + $0x104] ss:$16 sps:$4 sm:$0xff]  }
  0x1d   : > { %1471 = vmatpush3.bf16.msra.mxu0 %v1731_v22  ;;  %v1791_v1 = vld [vmem:[%s1993_s29 + $0x10c] ss:$16 sps:$4 sm:$0xff]   ;;  %v1793_v2 = vld [vmem:[%s1993_s29 + $0x100] ss:$16 sps:$4 sm:$0xff]   ;;  %v1794_v3 = vld [vmem:[%s1993_s29 + $0x108] ss:$16 sps:$4 sm:$0xff]  }
  0x1e   : > { %1583 = vmatpush3.bf16.msra.mxu1 %v1732_v23  ;;  %1472 = vmatprep.subr.bf16.mxu0 %v1733_v24  ;;  %v1795_v4 = vld [vmem:[%s1993_s29 + $0x124] ss:$16 sps:$4 sm:$0xff]   ;;  %v1797_v5 = vld [vmem:[%s1993_s29 + $0x12c] ss:$16 sps:$4 sm:$0xff]   ;;  %v1799_v6 = vld [vmem:[%s1993_s29 + $0x120] ss:$16 sps:$4 sm:$0xff]  }
  0x1f   : > { %1584 = vmatprep.subr.bf16.mxu1 %v1734_v25  ;;  %v1800_v7 = vld [vmem:[%s1993_s29 + $0x128] ss:$16 sps:$4 sm:$0xff]   ;;  %v1801_v8 = vld [vmem:[%s1993_s29 + $0x144] ss:$16 sps:$4 sm:$0xff]   ;;  %v1803_v9 = vld [vmem:[%s1993_s29 + $0x14c] ss:$16 sps:$4 sm:$0xff]  }
  0x20   : > { %v1805_v10 = vld [vmem:[%s1993_s29 + $0x140] ss:$16 sps:$4 sm:$0xff]   ;;  %v1806_v11 = vld [vmem:[%s1993_s29 + $0x148] ss:$16 sps:$4 sm:$0xff]   ;;  %v1807_v12 = vld [vmem:[%s1993_s29 + $0x164] ss:$16 sps:$4 sm:$0xff]  }
  0x21   : > { %1473 = vmatpush3.bf16.msra.mxu0 %v1735_v26  ;;  %v1809_v13 = vld [vmem:[%s1993_s29 + $0x16c] ss:$16 sps:$4 sm:$0xff]   ;;  %v1811_v14 = vld [vmem:[%s1993_s29 + $0x160] ss:$16 sps:$4 sm:$0xff]   ;;  %v1812_v15 = vld [vmem:[%s1993_s29 + $0x168] ss:$16 sps:$4 sm:$0xff]  }
  0x22   : > { %1585 = vmatpush3.bf16.msra.mxu1 %v1736_v27  ;;  %1474 = vmatprep.subr.bf16.mxu0 %v1737_v28  ;;  %v1813_v16 = vld [vmem:[%s1993_s29 + $0x184] ss:$16 sps:$4 sm:$0xff]   ;;  %v1815_v17 = vld [vmem:[%s1993_s29 + $0x18c] ss:$16 sps:$4 sm:$0xff]   ;;  %v1817_v18 = vld [vmem:[%s1993_s29 + $0x180] ss:$16 sps:$4 sm:$0xff]  }
  0x23   : > { %1586 = vmatprep.subr.bf16.mxu1 %v1738_v29  ;;  %v1818_v19 = vld [vmem:[%s1993_s29 + $0x188] ss:$16 sps:$4 sm:$0xff]   ;;  %v1819_v20 = vld [vmem:[%s1993_s29 + $0x1a4] ss:$16 sps:$4 sm:$0xff]   ;;  %v1821_v21 = vld [vmem:[%s1993_s29 + $0x1ac] ss:$16 sps:$4 sm:$0xff]  }
  0x24   : > { %v1823_v22 = vld [vmem:[%s1993_s29 + $0x1a0] ss:$16 sps:$4 sm:$0xff]   ;;  %v1824_v23 = vld [vmem:[%s1993_s29 + $0x1a8] ss:$16 sps:$4 sm:$0xff]   ;;  %v1825_v24 = vld [vmem:[%s1993_s29 + $0x1c4] ss:$16 sps:$4 sm:$0xff]  }
  0x25   : > { %1475 = vmatpush3.bf16.msra.mxu0 %v1739_v30  ;;  %v1827_v25 = vld [vmem:[%s1993_s29 + $0x1cc] ss:$16 sps:$4 sm:$0xff]   ;;  %v1829_v26 = vld [vmem:[%s1993_s29 + $0x1c0] ss:$16 sps:$4 sm:$0xff]   ;;  %v1830_v27 = vld [vmem:[%s1993_s29 + $0x1c8] ss:$16 sps:$4 sm:$0xff]  }
  0x26   : > { %1587 = vmatpush3.bf16.msra.mxu1 %v1740_v31  ;;  %v1831_v28 = vld [vmem:[%s1993_s29 + $0x1e4] ss:$16 sps:$4 sm:$0xff]   ;;  %v1833_v29 = vld [vmem:[%s1993_s29 + $0x1ec] ss:$16 sps:$4 sm:$0xff]   ;;  %v1835_v30 = vld [vmem:[%s1993_s29 + $0x1e0] ss:$16 sps:$4 sm:$0xff]  }
  0x27   : > { %v1836_v31 = vld [vmem:[%s1993_s29 + $0x1e8] ss:$16 sps:$4 sm:$0xff]  }
  0x28   : > { %925 = vmatmul.mubr.bf16.vlgmr.msra.gmra.mrb[0].mxu0 %v1741_v32 }
  0x29   : > { %1086 = vmatmul.mubr.bf16.vlgmr.msra.gmra.mrb[0].mxu1 %v1744_v34  ;;  %932 = vmatprep.mubr.bf16.mxu0 %v1747_v36 }
  0x2a   : > { %1093 = vmatprep.mubr.bf16.mxu1 %v1749_v37 }
  0x30   : > { %933 = vmatmul.mubr.bf16.gmra.mrb[4].mxu0 %v1751_v38 }
  0x31   : > { %1094 = vmatmul.mubr.bf16.gmra.mrb[4].mxu1 %v1752_v39  ;;  %940 = vmatprep.mubr.bf16.mxu0 %v1753_v40 }
  0x32   : > { %1101 = vmatprep.mubr.bf16.mxu1 %v1755_v41 }
  0x38   : > { %941 = vmatmul.mubr.bf16.gmra.mrb[8].mxu0 %v1757_v42 }
  0x39   : > { %1102 = vmatmul.mubr.bf16.gmra.mrb[8].mxu1 %v1758_v43  ;;  %948 = vmatprep.mubr.bf16.mxu0 %v1759_v44 }
  0x3a   : > { %1109 = vmatprep.mubr.bf16.mxu1 %v1761_v45 }
  0x40   : > { %949 = vmatmul.mubr.bf16.gmra.mrb[12].mxu0 %v1763_v46 }
  0x41   : > { %1110 = vmatmul.mubr.bf16.gmra.mrb[12].mxu1 %v1764_v47  ;;  %956 = vmatprep.mubr.bf16.mxu0 %v1765_v48 }
  0x42   : > { %1117 = vmatprep.mubr.bf16.mxu1 %v1767_v49 }
  0x48   : > { %957 = vmatmul.mubr.bf16.gmra.mrb[16].mxu0 %v1769_v50 }
  0x49   : > { %1118 = vmatmul.mubr.bf16.gmra.mrb[16].mxu1 %v1770_v51  ;;  %964 = vmatprep.mubr.bf16.mxu0 %v1771_v52 }
  0x4a   : > { %1125 = vmatprep.mubr.bf16.mxu1 %v1773_v53 }
  0x50   : > { %965 = vmatmul.mubr.bf16.gmra.mrb[20].mxu0 %v1775_v54 }
  0x51   : > { %1126 = vmatmul.mubr.bf16.gmra.mrb[20].mxu1 %v1776_v55  ;;  %972 = vmatprep.mubr.bf16.mxu0 %v1777_v56 }
  0x52   : > { %1133 = vmatprep.mubr.bf16.mxu1 %v1779_v57 }
  0x58   : > { %973 = vmatmul.mubr.bf16.gmra.mrb[24].mxu0 %v1781_v58 }
  0x59   : > { %1134 = vmatmul.mubr.bf16.gmra.mrb[24].mxu1 %v1782_v59  ;;  %980 = vmatprep.mubr.bf16.mxu0 %v1783_v60 }
  0x5a   : > { %1141 = vmatprep.mubr.bf16.mxu1 %v1785_v61 }
  0x60   : > { %981 = vmatmul.mubr.bf16.gmra.mrb[28].mxu0 %v1787_v62 }
  0x61   : > { %1142 = vmatmul.mubr.bf16.gmra.mrb[28].mxu1 %v1788_v63  ;;  %988 = vmatprep.mubr.bf16.mxu0 %v1789_v0 }
  0x62   : > { %1149 = vmatprep.mubr.bf16.mxu1 %v1791_v1 }
  0x68   : > { %989 = vmatmul.mubr.bf16.gmra.mrb[32].mxu0 %v1793_v2 }
  0x69   : > { %1150 = vmatmul.mubr.bf16.gmra.mrb[32].mxu1 %v1794_v3  ;;  %996 = vmatprep.mubr.bf16.mxu0 %v1795_v4 }
  0x6a   : > { %1157 = vmatprep.mubr.bf16.mxu1 %v1797_v5 }
  0x70   : > { %997 = vmatmul.mubr.bf16.gmra.mrb[36].mxu0 %v1799_v6 }
  0x71   : > { %1158 = vmatmul.mubr.bf16.gmra.mrb[36].mxu1 %v1800_v7  ;;  %1004 = vmatprep.mubr.bf16.mxu0 %v1801_v8 }
  0x72   : > { %1165 = vmatprep.mubr.bf16.mxu1 %v1803_v9 }
  0x78   : > { %1005 = vmatmul.mubr.bf16.gmra.mrb[40].mxu0 %v1805_v10 }
  0x79   : > { %1166 = vmatmul.mubr.bf16.gmra.mrb[40].mxu1 %v1806_v11  ;;  %1012 = vmatprep.mubr.bf16.mxu0 %v1807_v12 }
  0x7a   : > { %1173 = vmatprep.mubr.bf16.mxu1 %v1809_v13 }
  0x80   : > { %1013 = vmatmul.mubr.bf16.gmra.mrb[44].mxu0 %v1811_v14 }
  0x81   : > { %1174 = vmatmul.mubr.bf16.gmra.mrb[44].mxu1 %v1812_v15  ;;  %1020 = vmatprep.mubr.bf16.mxu0 %v1813_v16 }
  0x82   : > { %1181 = vmatprep.mubr.bf16.mxu1 %v1815_v17 }
  0x88   : > { %1021 = vmatmul.mubr.bf16.gmra.mrb[48].mxu0 %v1817_v18 }
  0x89   : > { %1182 = vmatmul.mubr.bf16.gmra.mrb[48].mxu1 %v1818_v19  ;;  %1028 = vmatprep.mubr.bf16.mxu0 %v1819_v20 }
  0x8a   : > { %1189 = vmatprep.mubr.bf16.mxu1 %v1821_v21 }
  0x90   : > { %1029 = vmatmul.mubr.bf16.gmra.mrb[52].mxu0 %v1823_v22 }
  0x91   : > { %1190 = vmatmul.mubr.bf16.gmra.mrb[52].mxu1 %v1824_v23  ;;  %1036 = vmatprep.mubr.bf16.mxu0 %v1825_v24 }
  0x92   : > { %1197 = vmatprep.mubr.bf16.mxu1 %v1827_v25 }
  0x98   : > { %1037 = vmatmul.mubr.bf16.gmra.mrb[56].mxu0 %v1829_v26 }
  0x99   : > { %1198 = vmatmul.mubr.bf16.gmra.mrb[56].mxu1 %v1830_v27  ;;  %1044 = vmatprep.mubr.bf16.mxu0 %v1831_v28 }
  0x9a   : > { %1205 = vmatprep.mubr.bf16.mxu1 %v1833_v29 }
  0xa0   : > { %1045 = vmatmul.mubr.bf16.gmra.mrb[60].mxu0 %v1835_v30 }
  0xa1   : > { %1206 = vmatmul.mubr.bf16.gmra.mrb[60].mxu1 %v1836_v31 }
  0xfb   : > { %v1476_v32 = vpop.f32.mrb[0].mxu0 }
  0xfc   : > { %v1588_v33 = vpop.f32.mrb[0].mxu1  ;;  %v1477_v34 = vpop.f32.mrb[1].mxu0 }
  0xfd   : > { %v1478_v35 = vadd.f32 %v1477_v34, %v1476_v32  ;;  %v1589_v36 = vpop.f32.mrb[1].mxu1  ;;  %v1479_v37 = vpop.f32.mrb[2].mxu0 }
  0xfe   : > { %v1590_v38 = vadd.f32 %v1589_v36, %v1588_v33  ;;  %v1591_v39 = vpop.f32.mrb[2].mxu1  ;;  %v1480_v40 = vpop.f32.mrb[3].mxu0 }
  0xff   : > { %v1481_v41 = vadd.f32 %v1480_v40, %v1479_v37  ;;  %v1592_v42 = vpop.f32.mrb[3].mxu1 }
 0x100   : > { %v1088_v43 = vadd.f32 %v1590_v38, %v1478_v35  ;;  %v1593_v44 = vadd.f32 %v1592_v42, %v1591_v39 }
 0x102   : > { %v1091_v45 = vadd.f32 %v1593_v44, %v1481_v41  ;;  %1246 = vst [vmem:[%s2069_s8] sm:$0xff] %v1088_v43 }
 0x103   : > { %v1482_v46 = vpop.f32.mrb[4].mxu0 }
 0x104   : > { %v1594_v47 = vpop.f32.mrb[4].mxu1  ;;  %v1483_v48 = vpop.f32.mrb[5].mxu0  ;;  %1247 = vst [vmem:[%s2069_s8 + $0x8] sm:$0xff] %v1091_v45 }
 0x105   : > { %v1484_v49 = vadd.f32 %v1483_v48, %v1482_v46  ;;  %v1595_v50 = vpop.f32.mrb[5].mxu1  ;;  %v1485_v51 = vpop.f32.mrb[6].mxu0 }
 0x106   : > { %v1596_v52 = vadd.f32 %v1595_v50, %v1594_v47  ;;  %v1597_v53 = vpop.f32.mrb[6].mxu1  ;;  %v1486_v54 = vpop.f32.mrb[7].mxu0 }
 0x107   : > { %v1487_v55 = vadd.f32 %v1486_v54, %v1485_v51  ;;  %v1598_v56 = vpop.f32.mrb[7].mxu1 }
 0x108   : > { %v1096_v57 = vadd.f32 %v1596_v52, %v1484_v49  ;;  %v1599_v58 = vadd.f32 %v1598_v56, %v1597_v53 }
 0x10a   : > { %v1099_v59 = vadd.f32 %v1599_v58, %v1487_v55  ;;  %1248 = vst [vmem:[%s2069_s8 + $0x10] sm:$0xff] %v1096_v57 }
 0x10b   : > { %v1488_v60 = vpop.f32.mrb[8].mxu0 }
 0x10c   : > { %v1600_v61 = vpop.f32.mrb[8].mxu1  ;;  %v1489_v62 = vpop.f32.mrb[9].mxu0  ;;  %1249 = vst [vmem:[%s2069_s8 + $0x18] sm:$0xff] %v1099_v59 }
 0x10d   : > { %v1490_v63 = vadd.f32 %v1489_v62, %v1488_v60  ;;  %v1601_v0 = vpop.f32.mrb[9].mxu1  ;;  %v1491_v1 = vpop.f32.mrb[10].mxu0 }
 0x10e   : > { %v1602_v2 = vadd.f32 %v1601_v0, %v1600_v61  ;;  %v1603_v3 = vpop.f32.mrb[10].mxu1  ;;  %v1492_v4 = vpop.f32.mrb[11].mxu0 }
 0x10f   : > { %v1493_v5 = vadd.f32 %v1492_v4, %v1491_v1  ;;  %v1604_v6 = vpop.f32.mrb[11].mxu1 }
 0x110   : > { %v1104_v7 = vadd.f32 %v1602_v2, %v1490_v63  ;;  %v1605_v8 = vadd.f32 %v1604_v6, %v1603_v3 }
 0x112   : > { %v1107_v9 = vadd.f32 %v1605_v8, %v1493_v5  ;;  %1250 = vst [vmem:[%s2069_s8 + $0x20] sm:$0xff] %v1104_v7 }
 0x113   : > { %v1494_v10 = vpop.f32.mrb[12].mxu0 }
 0x114   : > { %v1606_v11 = vpop.f32.mrb[12].mxu1  ;;  %v1495_v12 = vpop.f32.mrb[13].mxu0  ;;  %1251 = vst [vmem:[%s2069_s8 + $0x28] sm:$0xff] %v1107_v9 }
 0x115   : > { %v1496_v13 = vadd.f32 %v1495_v12, %v1494_v10  ;;  %v1607_v14 = vpop.f32.mrb[13].mxu1  ;;  %v1497_v15 = vpop.f32.mrb[14].mxu0 }
 0x116   : > { %v1608_v16 = vadd.f32 %v1607_v14, %v1606_v11  ;;  %v1609_v17 = vpop.f32.mrb[14].mxu1  ;;  %v1498_v18 = vpop.f32.mrb[15].mxu0 }
 0x117   : > { %v1499_v19 = vadd.f32 %v1498_v18, %v1497_v15  ;;  %v1610_v20 = vpop.f32.mrb[15].mxu1 }
 0x118   : > { %v1112_v21 = vadd.f32 %v1608_v16, %v1496_v13  ;;  %v1611_v22 = vadd.f32 %v1610_v20, %v1609_v17 }
 0x11a   : > { %v1115_v23 = vadd.f32 %v1611_v22, %v1499_v19  ;;  %1252 = vst [vmem:[%s2069_s8 + $0x30] sm:$0xff] %v1112_v21 }
 0x11b   : > { %v1500_v24 = vpop.f32.mrb[16].mxu0 }
 0x11c   : > { %v1612_v25 = vpop.f32.mrb[16].mxu1  ;;  %v1501_v26 = vpop.f32.mrb[17].mxu0  ;;  %1253 = vst [vmem:[%s2069_s8 + $0x38] sm:$0xff] %v1115_v23 }
 0x11d   : > { %v1502_v27 = vadd.f32 %v1501_v26, %v1500_v24  ;;  %v1613_v28 = vpop.f32.mrb[17].mxu1  ;;  %v1503_v29 = vpop.f32.mrb[18].mxu0 }
 0x11e   : > { %v1614_v30 = vadd.f32 %v1613_v28, %v1612_v25  ;;  %v1615_v31 = vpop.f32.mrb[18].mxu1  ;;  %v1504_v32 = vpop.f32.mrb[19].mxu0 }
 0x11f   : > { %v1505_v33 = vadd.f32 %v1504_v32, %v1503_v29  ;;  %v1616_v34 = vpop.f32.mrb[19].mxu1 }
 0x120   : > { %v1120_v35 = vadd.f32 %v1614_v30, %v1502_v27  ;;  %v1617_v36 = vadd.f32 %v1616_v34, %v1615_v31 }
 0x122   : > { %v1123_v37 = vadd.f32 %v1617_v36, %v1505_v33  ;;  %1254 = vst [vmem:[%s2069_s8 + $0x40] sm:$0xff] %v1120_v35 }
 0x123   : > { %v1506_v38 = vpop.f32.mrb[20].mxu0 }
 0x124   : > { %v1618_v39 = vpop.f32.mrb[20].mxu1  ;;  %v1507_v40 = vpop.f32.mrb[21].mxu0  ;;  %1255 = vst [vmem:[%s2069_s8 + $0x48] sm:$0xff] %v1123_v37 }
 0x125   : > { %v1508_v41 = vadd.f32 %v1507_v40, %v1506_v38  ;;  %v1619_v42 = vpop.f32.mrb[21].mxu1  ;;  %v1509_v43 = vpop.f32.mrb[22].mxu0 }
 0x126   : > { %v1620_v44 = vadd.f32 %v1619_v42, %v1618_v39  ;;  %v1621_v45 = vpop.f32.mrb[22].mxu1  ;;  %v1510_v46 = vpop.f32.mrb[23].mxu0 }
 0x127   : > { %v1511_v47 = vadd.f32 %v1510_v46, %v1509_v43  ;;  %v1622_v48 = vpop.f32.mrb[23].mxu1 }
 0x128   : > { %v1128_v49 = vadd.f32 %v1620_v44, %v1508_v41  ;;  %v1623_v50 = vadd.f32 %v1622_v48, %v1621_v45 }
 0x12a   : > { %v1131_v51 = vadd.f32 %v1623_v50, %v1511_v47  ;;  %1256 = vst [vmem:[%s2069_s8 + $0x50] sm:$0xff] %v1128_v49 }
 0x12b   : > { %v1512_v52 = vpop.f32.mrb[24].mxu0 }
 0x12c   : > { %v1624_v53 = vpop.f32.mrb[24].mxu1  ;;  %v1513_v54 = vpop.f32.mrb[25].mxu0  ;;  %1257 = vst [vmem:[%s2069_s8 + $0x58] sm:$0xff] %v1131_v51 }
 0x12d   : > { %v1514_v55 = vadd.f32 %v1513_v54, %v1512_v52  ;;  %v1625_v56 = vpop.f32.mrb[25].mxu1  ;;  %v1515_v57 = vpop.f32.mrb[26].mxu0 }
 0x12e   : > { %v1626_v58 = vadd.f32 %v1625_v56, %v1624_v53  ;;  %v1627_v59 = vpop.f32.mrb[26].mxu1  ;;  %v1516_v60 = vpop.f32.mrb[27].mxu0 }
 0x12f   : > { %v1517_v61 = vadd.f32 %v1516_v60, %v1515_v57  ;;  %v1628_v62 = vpop.f32.mrb[27].mxu1 }
 0x130   : > { %v1136_v63 = vadd.f32 %v1626_v58, %v1514_v55  ;;  %v1629_v0 = vadd.f32 %v1628_v62, %v1627_v59 }
 0x132   : > { %v1139_v1 = vadd.f32 %v1629_v0, %v1517_v61  ;;  %1258 = vst [vmem:[%s2069_s8 + $0x60] sm:$0xff] %v1136_v63 }
 0x133   : > { %v1518_v2 = vpop.f32.mrb[28].mxu0 }
 0x134   : > { %v1630_v3 = vpop.f32.mrb[28].mxu1  ;;  %v1519_v4 = vpop.f32.mrb[29].mxu0  ;;  %1259 = vst [vmem:[%s2069_s8 + $0x68] sm:$0xff] %v1139_v1 }
 0x135   : > { %v1520_v5 = vadd.f32 %v1519_v4, %v1518_v2  ;;  %v1631_v6 = vpop.f32.mrb[29].mxu1  ;;  %v1521_v7 = vpop.f32.mrb[30].mxu0 }
 0x136   : > { %v1632_v8 = vadd.f32 %v1631_v6, %v1630_v3  ;;  %v1633_v9 = vpop.f32.mrb[30].mxu1  ;;  %v1522_v10 = vpop.f32.mrb[31].mxu0 }
 0x137   : > { %v1523_v11 = vadd.f32 %v1522_v10, %v1521_v7  ;;  %v1634_v12 = vpop.f32.mrb[31].mxu1 }
 0x138   : > { %v1144_v13 = vadd.f32 %v1632_v8, %v1520_v5  ;;  %v1635_v14 = vadd.f32 %v1634_v12, %v1633_v9 }
 0x13a   : > { %v1147_v15 = vadd.f32 %v1635_v14, %v1523_v11  ;;  %1260 = vst [vmem:[%s2069_s8 + $0x70] sm:$0xff] %v1144_v13 }
 0x13b   : > { %v1524_v16 = vpop.f32.mrb[32].mxu0 }
 0x13c   : > { %v1636_v17 = vpop.f32.mrb[32].mxu1  ;;  %v1525_v18 = vpop.f32.mrb[33].mxu0  ;;  %1261 = vst [vmem:[%s2069_s8 + $0x78] sm:$0xff] %v1147_v15 }
 0x13d   : > { %v1526_v19 = vadd.f32 %v1525_v18, %v1524_v16  ;;  %v1637_v20 = vpop.f32.mrb[33].mxu1  ;;  %v1527_v21 = vpop.f32.mrb[34].mxu0 }
 0x13e   : > { %v1638_v22 = vadd.f32 %v1637_v20, %v1636_v17  ;;  %v1639_v23 = vpop.f32.mrb[34].mxu1  ;;  %v1528_v24 = vpop.f32.mrb[35].mxu0 }
 0x13f   : > { %v1529_v25 = vadd.f32 %v1528_v24, %v1527_v21  ;;  %v1640_v26 = vpop.f32.mrb[35].mxu1 }
 0x140   : > { %v1152_v27 = vadd.f32 %v1638_v22, %v1526_v19  ;;  %v1641_v28 = vadd.f32 %v1640_v26, %v1639_v23 }
 0x142   : > { %v1155_v29 = vadd.f32 %v1641_v28, %v1529_v25  ;;  %1262 = vst [vmem:[%s2069_s8 + $0x80] sm:$0xff] %v1152_v27 }
 0x143   : > { %v1530_v30 = vpop.f32.mrb[36].mxu0 }
 0x144   : > { %v1642_v31 = vpop.f32.mrb[36].mxu1  ;;  %v1531_v32 = vpop.f32.mrb[37].mxu0  ;;  %1263 = vst [vmem:[%s2069_s8 + $0x88] sm:$0xff] %v1155_v29 }
 0x145   : > { %v1532_v33 = vadd.f32 %v1531_v32, %v1530_v30  ;;  %v1643_v34 = vpop.f32.mrb[37].mxu1  ;;  %v1533_v35 = vpop.f32.mrb[38].mxu0 }
 0x146   : > { %v1644_v36 = vadd.f32 %v1643_v34, %v1642_v31  ;;  %v1645_v37 = vpop.f32.mrb[38].mxu1  ;;  %v1534_v38 = vpop.f32.mrb[39].mxu0 }
 0x147   : > { %v1535_v39 = vadd.f32 %v1534_v38, %v1533_v35  ;;  %v1646_v40 = vpop.f32.mrb[39].mxu1 }
 0x148   : > { %v1160_v41 = vadd.f32 %v1644_v36, %v1532_v33  ;;  %v1647_v42 = vadd.f32 %v1646_v40, %v1645_v37 }
 0x14a   : > { %v1163_v43 = vadd.f32 %v1647_v42, %v1535_v39  ;;  %1264 = vst [vmem:[%s2069_s8 + $0x90] sm:$0xff] %v1160_v41 }
 0x14b   : > { %v1536_v44 = vpop.f32.mrb[40].mxu0 }
 0x14c   : > { %v1648_v45 = vpop.f32.mrb[40].mxu1  ;;  %v1537_v46 = vpop.f32.mrb[41].mxu0  ;;  %1265 = vst [vmem:[%s2069_s8 + $0x98] sm:$0xff] %v1163_v43 }
 0x14d   : > { %v1538_v47 = vadd.f32 %v1537_v46, %v1536_v44  ;;  %v1649_v48 = vpop.f32.mrb[41].mxu1  ;;  %v1539_v49 = vpop.f32.mrb[42].mxu0 }
 0x14e   : > { %v1650_v50 = vadd.f32 %v1649_v48, %v1648_v45  ;;  %v1651_v51 = vpop.f32.mrb[42].mxu1  ;;  %v1540_v52 = vpop.f32.mrb[43].mxu0 }
 0x14f   : > { %v1541_v53 = vadd.f32 %v1540_v52, %v1539_v49  ;;  %v1652_v54 = vpop.f32.mrb[43].mxu1 }
 0x150   : > { %v1168_v55 = vadd.f32 %v1650_v50, %v1538_v47  ;;  %v1653_v56 = vadd.f32 %v1652_v54, %v1651_v51 }
 0x152   : > { %v1171_v57 = vadd.f32 %v1653_v56, %v1541_v53  ;;  %1266 = vst [vmem:[%s2069_s8 + $0xa0] sm:$0xff] %v1168_v55 }
 0x153   : > { %v1542_v58 = vpop.f32.mrb[44].mxu0 }
 0x154   : > { %v1654_v59 = vpop.f32.mrb[44].mxu1  ;;  %v1543_v60 = vpop.f32.mrb[45].mxu0  ;;  %1267 = vst [vmem:[%s2069_s8 + $0xa8] sm:$0xff] %v1171_v57 }
 0x155   : > { %v1544_v61 = vadd.f32 %v1543_v60, %v1542_v58  ;;  %v1655_v62 = vpop.f32.mrb[45].mxu1  ;;  %v1545_v63 = vpop.f32.mrb[46].mxu0 }
 0x156   : > { %v1656_v0 = vadd.f32 %v1655_v62, %v1654_v59  ;;  %v1657_v1 = vpop.f32.mrb[46].mxu1  ;;  %v1546_v2 = vpop.f32.mrb[47].mxu0 }
 0x157   : > { %v1547_v3 = vadd.f32 %v1546_v2, %v1545_v63  ;;  %v1658_v4 = vpop.f32.mrb[47].mxu1 }
 0x158   : > { %v1176_v5 = vadd.f32 %v1656_v0, %v1544_v61  ;;  %v1659_v6 = vadd.f32 %v1658_v4, %v1657_v1 }
 0x15a   : > { %v1179_v7 = vadd.f32 %v1659_v6, %v1547_v3  ;;  %1268 = vst [vmem:[%s2069_s8 + $0xb0] sm:$0xff] %v1176_v5 }
 0x15b   : > { %v1548_v8 = vpop.f32.mrb[48].mxu0 }
 0x15c   : > { %v1660_v9 = vpop.f32.mrb[48].mxu1  ;;  %v1549_v10 = vpop.f32.mrb[49].mxu0  ;;  %1269 = vst [vmem:[%s2069_s8 + $0xb8] sm:$0xff] %v1179_v7 }
 0x15d   : > { %v1550_v11 = vadd.f32 %v1549_v10, %v1548_v8  ;;  %v1661_v12 = vpop.f32.mrb[49].mxu1  ;;  %v1551_v13 = vpop.f32.mrb[50].mxu0 }
 0x15e   : > { %v1662_v14 = vadd.f32 %v1661_v12, %v1660_v9  ;;  %v1663_v15 = vpop.f32.mrb[50].mxu1  ;;  %v1552_v16 = vpop.f32.mrb[51].mxu0 }
 0x15f   : > { %v1553_v17 = vadd.f32 %v1552_v16, %v1551_v13  ;;  %v1664_v18 = vpop.f32.mrb[51].mxu1 }
 0x160   : > { %v1184_v19 = vadd.f32 %v1662_v14, %v1550_v11  ;;  %v1665_v20 = vadd.f32 %v1664_v18, %v1663_v15 }
 0x162   : > { %v1187_v21 = vadd.f32 %v1665_v20, %v1553_v17  ;;  %1270 = vst [vmem:[%s2069_s8 + $0xc0] sm:$0xff] %v1184_v19 }
 0x163   : > { %v1554_v22 = vpop.f32.mrb[52].mxu0 }
 0x164   : > { %v1666_v23 = vpop.f32.mrb[52].mxu1  ;;  %v1555_v24 = vpop.f32.mrb[53].mxu0  ;;  %1271 = vst [vmem:[%s2069_s8 + $0xc8] sm:$0xff] %v1187_v21 }
 0x165   : > { %v1556_v25 = vadd.f32 %v1555_v24, %v1554_v22  ;;  %v1667_v26 = vpop.f32.mrb[53].mxu1  ;;  %v1557_v27 = vpop.f32.mrb[54].mxu0 }
 0x166   : > { %v1668_v28 = vadd.f32 %v1667_v26, %v1666_v23  ;;  %v1669_v29 = vpop.f32.mrb[54].mxu1  ;;  %v1558_v30 = vpop.f32.mrb[55].mxu0 }
 0x167   : > { %v1559_v31 = vadd.f32 %v1558_v30, %v1557_v27  ;;  %v1670_v32 = vpop.f32.mrb[55].mxu1 }
 0x168   : > { %v1192_v33 = vadd.f32 %v1668_v28, %v1556_v25  ;;  %v1671_v34 = vadd.f32 %v1670_v32, %v1669_v29 }
 0x16a   : > { %v1195_v35 = vadd.f32 %v1671_v34, %v1559_v31  ;;  %1272 = vst [vmem:[%s2069_s8 + $0xd0] sm:$0xff] %v1192_v33 }
 0x16b   : > { %v1560_v36 = vpop.f32.mrb[56].mxu0 }
 0x16c   : > { %v1672_v37 = vpop.f32.mrb[56].mxu1  ;;  %v1561_v38 = vpop.f32.mrb[57].mxu0  ;;  %1273 = vst [vmem:[%s2069_s8 + $0xd8] sm:$0xff] %v1195_v35 }
 0x16d   : > { %v1562_v39 = vadd.f32 %v1561_v38, %v1560_v36  ;;  %v1673_v40 = vpop.f32.mrb[57].mxu1  ;;  %v1563_v41 = vpop.f32.mrb[58].mxu0 }
 0x16e   : > { %v1674_v42 = vadd.f32 %v1673_v40, %v1672_v37  ;;  %v1675_v43 = vpop.f32.mrb[58].mxu1  ;;  %v1564_v44 = vpop.f32.mrb[59].mxu0 }
 0x16f   : > { %v1565_v45 = vadd.f32 %v1564_v44, %v1563_v41  ;;  %v1676_v46 = vpop.f32.mrb[59].mxu1 }
 0x170   : > { %v1200_v47 = vadd.f32 %v1674_v42, %v1562_v39  ;;  %v1677_v48 = vadd.f32 %v1676_v46, %v1675_v43 }
 0x172   : > { %v1203_v49 = vadd.f32 %v1677_v48, %v1565_v45  ;;  %1274 = vst [vmem:[%s2069_s8 + $0xe0] sm:$0xff] %v1200_v47 }
 0x173   : > { %v1566_v50 = vpop.f32.mrb[60].mxu0 }
 0x174   : > { %v1678_v51 = vpop.f32.mrb[60].mxu1  ;;  %v1567_v52 = vpop.f32.mrb[61].mxu0  ;;  %1275 = vst [vmem:[%s2069_s8 + $0xe8] sm:$0xff] %v1203_v49 }
 0x175   : > { %v1568_v53 = vadd.f32 %v1567_v52, %v1566_v50  ;;  %v1679_v54 = vpop.f32.mrb[61].mxu1  ;;  %v1569_v55 = vpop.f32.mrb[62].mxu0 }
 0x176   : > { %v1680_v56 = vadd.f32 %v1679_v54, %v1678_v51  ;;  %v1681_v57 = vpop.f32.mrb[62].mxu1  ;;  %v1570_v58 = vpop.f32.mrb[63].mxu0 }
 0x177   : > { %v1571_v59 = vadd.f32 %v1570_v58, %v1569_v55  ;;  %v1682_v60 = vpop.f32.mrb[63].mxu1 }
 0x178   : > { %v1208_v61 = vadd.f32 %v1680_v56, %v1568_v53  ;;  %v1683_v62 = vadd.f32 %v1682_v60, %v1681_v57 }
 0x17a   : > { %v1211_v63 = vadd.f32 %v1683_v62, %v1571_v59  ;;  %1276 = vst [vmem:[%s2069_s8 + $0xf0] sm:$0xff] %v1208_v61 }
 0x17c   : > { %1277 = vst [vmem:[%s2069_s8 + $0xf8] sm:$0xff] %v1211_v63 }
 0x17d PF: > { %s12_s11 = sadd.s32 1, %s1859_s11   ;;  %s2115_s9 = smov %s1855_s10 }
 0x17e   : > { %p9_p5 = scmp.ge.s32.totalorder %s12_s11, 4   ;;  %s2116_s10 = smov %s2118_s12 }
 0x180   :  { %11 = sbr.rel (!%p9_p5) target bundleno = 2 (0x2), region = 63 }

</bundles_post_ra>
